<compile_context>
chip_gen: v7x
topology: tpu7x:2x2x1
jax: 0.10.0
libtpu: 0.0.40
codegen_flags: <defaults>
</compile_context>

<pallas_src>
import functools
import numpy as np
import jax
import jax.numpy as jnp
from jax import lax
from jax.experimental import pallas as pl
from jax.experimental.pallas import tpu as pltpu


def _round_up(x: int, m: int) -> int:
    return ((x + m - 1) // m) * m


def _cdiv(a: int, b: int) -> int:
    return -(-a // b)


def _largest_divisor_tile(total: int, maxt: int, mult: int = 128) -> int:
    """Largest multiple of `mult` that divides `total`, capped at `maxt` (total % mult == 0)."""
    t = max(mult, min(maxt, total))
    t = (t // mult) * mult
    while total % t:
        t -= mult
    return t


def _working_set_bytes(tm: int, tn: int, tk: int) -> int:
    # double-buffered z (bf16) + W (bf16) + bias (f32) + resident/double-buffered out (f32)
    return 2 * (tm * tk * 2 + tk * tn * 2 + tn * 4 + tm * tn * 4)


def _heads_kernel(sess_ref, z_ref, w_ref, b_ref, o_ref, *,
                  apply_log_softmax: bool, valid_n: int):
    """Tiled z @ W with f32 accumulation directly in the resident output block.

    Bias is written at k==0, every k step adds a partial product, and the optional
    log_softmax runs in the k==last epilogue.  No pl.program_id / pl.num_programs calls
    inside pl.when bodies (interpret-mode safe); `valid_n` is a static int.
    """
    del sess_ref  # only used by the index_maps
    k = pl.program_id(2)
    nk = pl.num_programs(2)

    @pl.when(k == 0)
    def _init():
        o_ref[...] = jnp.broadcast_to(b_ref[...].astype(jnp.float32), o_ref.shape)

    # bf16 x bf16 -> f32 on the MXU; inner loop is a pure matmul push + VPU add.
    o_ref[...] += jnp.dot(z_ref[...], w_ref[...], preferred_element_type=jnp.float32)

    if apply_log_softmax:
        @pl.when(k == nk - 1)
        def _softmax():
            acc = o_ref[...]
            col = lax.broadcasted_iota(jnp.int32, acc.shape, 1)
            valid = col < valid_n
            masked = jnp.where(valid, acc, -jnp.inf)
            m = jnp.max(masked, axis=-1, keepdims=True)
            shifted = masked - m
            lse = jnp.log(jnp.sum(jnp.exp(shifted), axis=-1, keepdims=True))
            # Write 0 (not -inf) into the padded lanes so the padded buffer stays benign.
            o_ref[...] = jnp.where(valid, shifted - lse, 0.0)


def linear_heads_pallas(z, w_stacked, b_stacked, sess_idx, *,
                        out_dim: int, softmax: bool = False,
                        tm_max: int = 256, tn_max: int = 512, tk_max: int = 2048):
    """Apply the session head selected by `sess_idx` (+ optional log_softmax).

    z:         (B, ...)                       flattened to (B, in_dim)
    w_stacked: (S, in_pad, out_pad) bf16      pre-transposed, zero-padded weights
    b_stacked: (S, 1, out_pad)      f32       zero-padded biases
    sess_idx:  int32 scalar                   which head to use (dynamic)
    out_dim:   static int                     real out_dim of this session
    """
    B = z.shape[0]
    z2 = z.reshape(B, -1)
    in_dim = z2.shape[1]
    _, in_pad, out_pad = w_stacked.shape
    assert in_pad % 128 == 0 and out_pad % 128 == 0 and in_pad >= in_dim
    assert 1 <= out_dim <= out_pad

    # ---- tile selection (static) ----
    tk = _largest_divisor_tile(in_pad, tk_max)
    if softmax:
        tn = out_pad                           # softmax reduction must see the whole row
    else:
        tn = _largest_divisor_tile(out_pad, tn_max)

    tm_cap = max(16, (min(tm_max, 256) // 16) * 16)
    if softmax:
        # Bound the wide-N working set so it also fits v7x's smaller VMEM.
        vmem_budget = 20 * 1024 * 1024
        while _working_set_bytes(tm_cap, tn, tk) > vmem_budget:
            if tk > 128:
                tk = _largest_divisor_tile(in_pad, tk - 128)
            elif tm_cap > 16:
                tm_cap //= 2
            else:
                break

    n_mtiles = _cdiv(B, tm_cap)
    tm = min(_round_up(_cdiv(B, n_mtiles), 16), tm_cap)
    b_pad = tm * n_mtiles

    # ---- feed the MXU bf16; zero-pad batch / reduction dims only when needed ----
    z2 = z2.astype(jnp.bfloat16)
    if b_pad != B or in_pad != in_dim:
        z2 = jnp.pad(z2, ((0, b_pad - B), (0, in_pad - in_dim)))

    sess_arr = jnp.asarray(sess_idx, jnp.int32).reshape((1,))

    grid = (b_pad // tm, out_pad // tn, in_pad // tk)
    kernel = functools.partial(_heads_kernel, apply_log_softmax=softmax, valid_n=out_dim)

    est = _working_set_bytes(tm, tn, tk)
    vmem_limit = int(min(max(2 * est, 32 * 1024 * 1024), 64 * 1024 * 1024))

    out = pl.pallas_call(
        kernel,
        out_shape=jax.ShapeDtypeStruct((b_pad, out_pad), jnp.float32),
        grid_spec=pltpu.PrefetchScalarGridSpec(
            num_scalar_prefetch=1,
            grid=grid,
            in_specs=[
                pl.BlockSpec((tm, tk), lambda i, j, k, sess: (i, k)),
                pl.BlockSpec((None, tk, tn), lambda i, j, k, sess: (sess[0], k, j)),
                pl.BlockSpec((None, 1, tn), lambda i, j, k, sess: (sess[0], 0, j)),
            ],
            out_specs=pl.BlockSpec((tm, tn), lambda i, j, k, sess: (i, j)),
        ),
        compiler_params=pltpu.CompilerParams(
            dimension_semantics=("parallel", "parallel", "arbitrary"),
            vmem_limit_bytes=vmem_limit,
        ),
    )(sess_arr, z2, w_stacked, b_stacked)

    return out[:B, :out_dim]


class LinearDecoder:
    """JAX/Pallas port of the `linear` decoder module (multi-session output heads)."""

    def __init__(self, in_dim, output_dim_per_session, id_per_sess=None,
                 softmax=False, key=None):
        if not hasattr(output_dim_per_session, "__iter__"):
            output_dim_per_session = [output_dim_per_session]
        output_dim_per_session = [int(d) for d in output_dim_per_session]
        assert min(output_dim_per_session) >= 1
        if id_per_sess is None:
            id_per_sess = np.arange(len(output_dim_per_session))
        self.id_per_sess = np.asarray(id_per_sess)
        self.softmax = bool(softmax)
        self.in_dim = int(in_dim)
        self.out_dims = output_dim_per_session

        # Padded, MXU-friendly parameter layout built ONCE at init:
        #   weights pre-transposed to (in_dim, out_dim); in_dim padded to 128 (lane/sublane
        #   alignment only, no tk_max rounding), out_dim padded to 128 lanes; all session
        #   heads stacked; stored in bf16 (f32 accumulation in-kernel).
        max_out = max(output_dim_per_session)
        self.out_pad = _round_up(max_out, 128)
        self.in_pad = _round_up(self.in_dim, 128)

        if key is None:
            key = jax.random.PRNGKey(0)
        bound = 1.0 / float(np.sqrt(in_dim))
        n_sess = len(output_dim_per_session)
        w_stacked = np.zeros((n_sess, self.in_pad, self.out_pad), np.float32)
        b_stacked = np.zeros((n_sess, 1, self.out_pad), np.float32)
        for s, od in enumerate(output_dim_per_session):
            key, wk, bk = jax.random.split(key, 3)
            w = jax.random.uniform(wk, (od, in_dim), jnp.float32, -bound, bound)
            b = jax.random.uniform(bk, (od,), jnp.float32, -bound, bound)
            w_stacked[s, :in_dim, :od] = np.asarray(w).T
            b_stacked[s, 0, :od] = np.asarray(b)
        self.w_stacked = jnp.asarray(w_stacked, jnp.bfloat16)
        self.b_stacked = jnp.asarray(b_stacked, jnp.float32)

        self._apply = jax.jit(
            linear_heads_pallas,
            static_argnames=("out_dim", "softmax", "tm_max", "tn_max", "tk_max"))

    def __call__(self, z, sess_id=0):
        idx = int(np.where(self.id_per_sess == sess_id)[0][0])
        return self._apply(z, self.w_stacked, self.b_stacked, np.int32(idx),
                           out_dim=self.out_dims[idx], softmax=self.softmax)


if __name__ == "__main__":
    key = jax.random.PRNGKey(0)
    k_z, k_params = jax.random.split(key)

    # Small shapes: batch=2, z of shape (2, 4, 8) -> flattened in_dim = 32.
    B, T, D = 2, 4, 8
    in_dim = T * D
    output_dim_per_session = [16, 24]   # two sessions with different output dims

    z = jax.random.normal(k_z, (B, T, D), dtype=jnp.float32)

    # Heads without softmax
    dec = LinearDecoder(in_dim, output_dim_per_session, softmax=False, key=k_params)
    out0 = dec(z, sess_id=0)            # (2, 16)
    out1 = dec(z, sess_id=1)            # (2, 24)

    # Head with log_softmax
    dec_sm = LinearDecoder(in_dim, output_dim_per_session, softmax=True, key=k_params)
    out_sm = dec_sm(z, sess_id=0)       # (2, 16), rows are log-probabilities

    jax.block_until_ready((out0, out1, out_sm))

    # ---- lightweight correctness check vs plain-JAX reference (same bf16-rounded inputs) ----
    z2 = z.reshape(B, -1).astype(jnp.bfloat16).astype(jnp.float32)

    def ref_head(decoder, idx):
        od = decoder.out_dims[idx]
        w = decoder.w_stacked[idx, :in_dim, :od].astype(jnp.float32)
        b = decoder.b_stacked[idx, 0, :od]
        return jnp.dot(z2, w, precision=jax.lax.Precision.HIGHEST) + b

    ref0 = ref_head(dec, 0)
    ref1 = ref_head(dec, 1)
    ref_sm = jax.nn.log_softmax(ref_head(dec_sm, 0), axis=-1)

    assert out0.shape == (B, 16) and out1.shape == (B, 24) and out_sm.shape == (B, 16)
    assert jnp.allclose(out0, ref0, atol=1e-4), "linear head 0 mismatch"
    assert jnp.allclose(out1, ref1, atol=1e-4), "linear head 1 mismatch"
    assert jnp.allclose(out_sm, ref_sm, atol=1e-4), "log_softmax head mismatch"

    print("KERNEL_OK")
</pallas_src>

<mosaic_0001>
module attributes {stable_mosaic.version = 11 : i64} {
  func.func @_heads_kernel(%arg0: i32, %arg1: i32, %arg2: i32, %arg3: memref<1xi32, #tpu.memory_space<smem>>, %arg4: memref<16x128xbf16, #tpu.memory_space<vmem>>, %arg5: memref<1x128x128xbf16, #tpu.memory_space<vmem>>, %arg6: memref<1x1x128xf32, #tpu.memory_space<vmem>>, %arg7: memref<16x128xf32, #tpu.memory_space<vmem>>) attributes {dimension_semantics = [#tpu.dimension_semantics<parallel>, #tpu.dimension_semantics<parallel>, #tpu.dimension_semantics<arbitrary>], iteration_bounds = array<i64: 1, 1, 1>, scalar_prefetch = 1 : i64, scratch_operands = 0 : i64, tpu.core_type = #tpu.core_type<tc>, window_params = [{transform_indices = @transform_0, window_bounds = array<i64: 16, 128>}, {transform_indices = @transform_1, window_bounds = array<i64: 1, 128, 128>}, {transform_indices = @transform_2, window_bounds = array<i64: 1, 1, 128>}, {transform_indices = @transform_3, window_bounds = array<i64: 16, 128>}]} {
    %c0_i32 = arith.constant 0 : i32
    %0 = arith.cmpi eq, %arg2, %c0_i32 : i32
    %1 = arith.extui %0 : i1 to i32
    %c0_i32_0 = arith.constant 0 : i32
    %2 = arith.cmpi ne, %1, %c0_i32_0 : i32
    scf.if %2 {
      %c0_9 = arith.constant 0 : index
      %c0_10 = arith.constant 0 : index
      %c0_11 = arith.constant 0 : index
      %10 = vector.load %arg6[%c0_9, %c0_10, %c0_11] : memref<1x1x128xf32, #tpu.memory_space<vmem>>, vector<1x1x128xf32>
      %11 = vector.shape_cast %10 : vector<1x1x128xf32> to vector<1x128xf32>
      %12 = vector.shape_cast %11 : vector<1x128xf32> to vector<1x128xf32>
      %13 = vector.broadcast %12 : vector<1x128xf32> to vector<16x128xf32>
      %c0_12 = arith.constant 0 : index
      %c0_13 = arith.constant 0 : index
      %14 = vector.load %arg7[%c0_12, %c0_13] : memref<16x128xf32, #tpu.memory_space<vmem>>, vector<16x128xf32>
      tpu.vector_store %arg7[%c0_12, %c0_13], %13 {strides = array<i32>} : memref<16x128xf32, #tpu.memory_space<vmem>>, vector<16x128xf32>,
    } else {
    }
    %c0 = arith.constant 0 : index
    %c0_1 = arith.constant 0 : index
    %3 = vector.load %arg7[%c0, %c0_1] : memref<16x128xf32, #tpu.memory_space<vmem>>, vector<16x128xf32>
    %c0_2 = arith.constant 0 : index
    %c0_3 = arith.constant 0 : index
    %4 = vector.load %arg4[%c0_2, %c0_3] : memref<16x128xbf16, #tpu.memory_space<vmem>>, vector<16x128xbf16>
    %c0_4 = arith.constant 0 : index
    %c0_5 = arith.constant 0 : index
    %c0_6 = arith.constant 0 : index
    %5 = vector.load %arg5[%c0_4, %c0_5, %c0_6] : memref<1x128x128xbf16, #tpu.memory_space<vmem>>, vector<1x128x128xbf16>
    %6 = vector.shape_cast %5 : vector<1x128x128xbf16> to vector<128x128xbf16>
    %cst = arith.constant dense<0.000000e+00> : vector<16x128xf32>
    %7 = tpu.matmul %4, %6, %cst {dimension_numbers = #tpu.dot_dimension_numbers<[1], [0], [0], [1], [0, 0, 1, 1], [], []>} : vector<16x128xbf16>, vector<128x128xbf16>, vector<16x128xf32> -> vector<16x128xf32>
    %8 = arith.addf %3, %7 : vector<16x128xf32>
    %c0_7 = arith.constant 0 : index
    %c0_8 = arith.constant 0 : index
    %9 = vector.load %arg7[%c0_7, %c0_8] : memref<16x128xf32, #tpu.memory_space<vmem>>, vector<16x128xf32>
    tpu.vector_store %arg7[%c0_7, %c0_8], %8 {strides = array<i32>} : memref<16x128xf32, #tpu.memory_space<vmem>>, vector<16x128xf32>,
    return
  }
  func.func @transform_0(%arg0: i32, %arg1: i32, %arg2: i32, %arg3: memref<1xi32, #tpu.memory_space<smem>>) -> (i32, i32) {
    %c0_i32 = arith.constant 0 : i32
    return %arg0, %arg2 : i32, i32
  }
  func.func @transform_1(%arg0: i32, %arg1: i32, %arg2: i32, %arg3: memref<1xi32, #tpu.memory_space<smem>>) -> (i32, i32, i32) {
    %c0 = arith.constant 0 : index
    %0 = memref.load %arg3[%c0] : memref<1xi32, #tpu.memory_space<smem>>
    %c0_i32 = arith.constant 0 : i32
    return %0, %arg2, %arg1 : i32, i32, i32
  }
  func.func @transform_2(%arg0: i32, %arg1: i32, %arg2: i32, %arg3: memref<1xi32, #tpu.memory_space<smem>>) -> (i32, i32, i32) {
    %c0 = arith.constant 0 : index
    %0 = memref.load %arg3[%c0] : memref<1xi32, #tpu.memory_space<smem>>
    %c0_i32 = arith.constant 0 : i32
    %c0_i32_0 = arith.constant 0 : i32
    return %0, %c0_i32, %arg1 : i32, i32, i32
  }
  func.func @transform_3(%arg0: i32, %arg1: i32, %arg2: i32, %arg3: memref<1xi32, #tpu.memory_space<smem>>) -> (i32, i32) {
    %c0_i32 = arith.constant 0 : i32
    return %arg0, %arg1 : i32, i32
  }
}

</mosaic_0001>

<bundles_post_ra>
// kernel: linear_heads_pallas.1
= control target key start
LH: loop header
LB: loop body
LE: loop exit
PB: predicated region body
PF: predicated region fallthrough
CT: control target
= control target key end

     0   :  { %10 = vsyncpa [#allocation5], 0  ;;  %s274_s21 = smov [#allocation4]   ;;  %s334_s0 = inlined_call_operand.<no memory space> [shape: s32[1], index: 0, kind: input, shape index: {}]   ;;  %s335_s1 = inlined_call_operand.vmem [shape: bf16[16,128], index: 1, kind: input, shape index: {}]   ;;  %s336_s2 = inlined_call_operand.hbm [shape: bf16[2,128,128], index: 2, kind: input, shape index: {}]   ;;  %s337_s3 = inlined_call_operand.vmem [shape: f32[2,1,128], index: 3, kind: input, shape index: {}]   ;;  %s338_s4 = inlined_call_operand.vmem [shape: f32[16,128], index: 4, kind: output, shape index: {}]  }
   0x1   :  { %s204_s17 = sshll.u32 %s334_s0, 10  ;;  %s22_s22 = sshll.u32 %s274_s21, 4  ;;  %s23_s22 = int_to_ptr.vmem [resolvable:$true] %s22_s22 }
   0x2   :  { %s21_s20 = scalar_lea.hbm %s336_s2, %s204_s17  ;;  %s250_s26 = scalar_lea.hbm %s336_s2, 2048 }
   0x3   :  { %s248_s23 = scalar_lea.hbm %s21_s20, 1024  ;;  %p251_p1 = scmp.lt.u32.totalorder %s21_s20, %s336_s2 }
   0x4   :  { %p249_p0 = scmp.ne.s32.totalorder %s21_s20, %s248_s23  ;;  %p252_p2 = scmp.lt.u32.totalorder %s250_s26, %s248_s23 }
   0x5   :  { %p254_p4 = scmp.lt.u32.totalorder %s248_s23, %s21_s20 }
   0x6   :  { %p253_p3 = por %p252_p2, %p251_p1 }
   0x8   :  { %p255_p5 = por %p254_p4, %p253_p3 }
   0xa   :  { %p256_p6 = pnand %p255_p5, %p249_p0 }
   0xc   :  { %259 = shalt.err (!%p256_p6)
}
   0xd   :  { %s260_s29 = scalar_lea.vmem %s23_s22, 1024  ;;  %p265_p8 = scmp.lt.s32.totalorder %s23_s22, %s23_s22 }
   0xe   :  { %p261_p7 = scmp.ne.s32.totalorder %s23_s22, %s260_s29  ;;  %p266_p9 = scmp.lt.s32.totalorder %s260_s29, %s260_s29 }
  0x10   :  { %p267_p10 = por %p266_p9, %p265_p8 }
  0x12   :  { %p268_p11 = pnand %p267_p10, %p261_p7 }
  0x14   :  { %271 = shalt.err (!%p268_p11)
}
  0x15   :  { %s275_s30 = smov 64   ;;  %s276_s5 = smov 4  }
  0x16   :  { %28 = dma.hbm_to_vmem [thread:$0]  %s21_s20, 1024, %s23_s22, [#allocation5], %s275_s30, %s275_s30, %s276_s5  }
  0x17   :  { %272 = dma.done.wait [#allocation5], 1024  }
  0x18   :  { %273 = vsyncadd [#allocation5], 4294966272  ;;  %v277_v0 = vmov 0.0   ;;  %vm278_vm0 = vmmov 0   ;;  %v239_v1 = vld [vmem:[#allocation4] sm:$0xff]   ;;  %v240_v2 = vld [vmem:[#allocation4 + $0x8] sm:$0xff]  }
  0x19   :  { %214 = vmatprep.subr.bf16.mxu0 %v277_v0  ;;  %230 = vmatprep.mubr.msk.bf16.mxu0 %vm278_vm0, %v277_v0  ;;  %v241_v3 = vld [vmem:[#allocation4 + $0x10] sm:$0xff]   ;;  %v242_v4 = vld [vmem:[#allocation4 + $0x18] sm:$0xff]   ;;  %v243_v5 = vld [vmem:[#allocation4 + $0x20] sm:$0xff]   ;;  %p45_p12 = scmp.lt.s32.totalorder %s334_s0, 1 }
  0x1a   :  { %215 = vmatpush3.bf16.msra.mxu0 %v239_v1  ;;  %v244_v6 = vld [vmem:[#allocation4 + $0x28] sm:$0xff]   ;;  %v245_v7 = vld [vmem:[#allocation4 + $0x30] sm:$0xff]   ;;  %v246_v8 = vld [vmem:[#allocation4 + $0x38] sm:$0xff]  }
  0x1b   :  { %216 = vmatprep.subr.bf16.mxu0 %v277_v0  ;;  %v247_v9 = vld [vmem:[%s335_s1] sm:$0xff]   ;;  %s340_s0 = smov (!%p45_p12, %s334_s0), 1 }
  0x1c   :  { %s47_s13 = scalar_lea.vmem %s337_s3, %s340_s0 }
  0x1d   :  { %v194_v10 = vld [vmem:[%s47_s13] ss:$0 sm:$0xff] }
  0x1e   :  { %217 = vmatpush3.bf16.msra.mxu0 %v240_v2 }
  0x1f   :  { %218 = vmatprep.subr.bf16.mxu0 %v277_v0 }
  0x22   :  { %219 = vmatpush3.bf16.msra.mxu0 %v241_v3 }
  0x23   :  { %220 = vmatprep.subr.bf16.mxu0 %v277_v0 }
  0x26   :  { %221 = vmatpush3.bf16.msra.mxu0 %v242_v4 }
  0x27   :  { %222 = vmatprep.subr.bf16.mxu0 %v277_v0 }
  0x2a   :  { %223 = vmatpush3.bf16.msra.mxu0 %v243_v5 }
  0x2b   :  { %224 = vmatprep.subr.bf16.mxu0 %v277_v0 }
  0x2e   :  { %225 = vmatpush3.bf16.msra.mxu0 %v244_v6 }
  0x2f   :  { %226 = vmatprep.subr.bf16.mxu0 %v277_v0 }
  0x32   :  { %227 = vmatpush3.bf16.msra.mxu0 %v245_v7 }
  0x33   :  { %228 = vmatprep.subr.bf16.mxu0 %v277_v0 }
  0x36   :  { %229 = vmatpush3.bf16.msra.mxu0 %v246_v8 }
  0x39   :  { %231 = vmatmul.mubr.bf16.vlgmr.msra.gmra.mrb[0].mxu0 %v247_v9 }
 0x10c   :  { %v171_v11 = vpop.f32.mrb[0].mxu0 }
 0x10d   :  { %v178_v12 = vadd.f32 %v194_v10, %v171_v11  ;;  %v232_v13 = vpop.f32.mrb[1].mxu0 }
 0x10e   :  { %v174_v14 = vpop.f32.mrb[2].mxu0 }
 0x10f   :  { %180 = vst [vmem:[%s338_s4] sm:$0xff] %v178_v12  ;;  %v179_v15 = vadd.f32 %v194_v10, %v174_v14  ;;  %v233_v16 = vpop.f32.mrb[3].mxu0 }
 0x111   :  { %181 = vst [vmem:[%s338_s4 + $0x8] sm:$0xff] %v179_v15 }
 0x112   :  { %186 = vsyncpa [#allocation5], 1 }

</bundles_post_ra>
